<compile_context>
chip_gen: v5e
topology: v5e:2x2
jax: 0.10.0
libtpu: 0.0.40
codegen_flags: <defaults>
</compile_context>

<pallas_src>
import numpy as np
import jax
import jax.numpy as jnp
from jax.experimental import pallas as pl
from jax.experimental.pallas import tpu as pltpu


def _round_up(v: int, m: int) -> int:
    return (v + m - 1) // m * m


def _chip_config():
    """Per-generation block sizing / pipelining knobs (see perf review)."""
    kind = ""
    try:
        kind = jax.devices()[0].device_kind.lower()
    except Exception:
        pass
    if "v7" in kind:
        # 64 MiB physical VMEM: keep blocks modest, deepen the input pipeline,
        # and ask for >=16 grid steps so both TensorCores get balanced work.
        return dict(target_block_bytes=4 << 20, vmem_limit_bytes=None,
                    input_buffers=3, min_grid_steps=16)
    if "v6" in kind:
        # 128 MiB physical VMEM: bigger blocks + raised scoped-VMEM limit.
        return dict(target_block_bytes=6 << 20, vmem_limit_bytes=64 << 20,
                    input_buffers=2, min_grid_steps=8)
    if "v5 lite" in kind or "v5e" in kind:
        # 16 MiB default scoped VMEM: small blocks so in+out double-buffers fit.
        return dict(target_block_bytes=(3 << 20) // 2, vmem_limit_bytes=None,
                    input_buffers=2, min_grid_steps=8)
    # Unknown chip: conservative default that fits every generation's defaults.
    return dict(target_block_bytes=2 << 20, vmem_limit_bytes=None,
                input_buffers=2, min_grid_steps=8)


def _make_kernel(rb: int):
    def kernel(params_ref, x_ref, o_ref):
        # params_ref is the full, VMEM-resident (r_pad, 2) table:
        #   col 0 = exp(Lambda) for this plane's channel, col 1 = exp(Alpha).
        # Slice this row-block's rows; rb is compile-time and i*rb is rb-aligned.
        r0 = pl.multiple_of(pl.program_id(0) * rb, rb)
        p = params_ref[pl.ds(r0, rb), :]              # (rb, 2)
        lam = p[:, 0:1]                               # (rb, 1) exponent (> 0)
        alpha = p[:, 1:2]                             # (rb, 1) bias
        x = x_ref[...].astype(jnp.float32)            # (rb, lb)
        # Positive-base power: exp2(lam * log2(x)). Avoids XLA's generic pow
        # expansion (extra selects / VALU work). x == 0 -> log2 = -inf ->
        # exp2 = 0, matching 0**p for p > 0, same as the torch reference.
        o = jnp.exp2(lam * jnp.log2(x)) + alpha
        o_ref[...] = o.astype(o_ref.dtype)
    return kernel


def pospowbias(x: jnp.ndarray, Lambda: jnp.ndarray, Alpha: jnp.ndarray) -> jnp.ndarray:
    """Pallas implementation of pospowbias(in_channels=C).forward(x).

    x:      (N, C, H, W)
    Lambda: (C,) raw parameter (exp applied here, matching the module)
    Alpha:  (C,) raw parameter
    """
    n, c, h, w = x.shape
    assert Lambda.shape == (c,) and Alpha.shape == (c,)

    cfg = _chip_config()
    target = cfg["target_block_bytes"]

    r = n * c                       # number of (n, c) planes
    l = h * w                       # lane-dense plane length
    itemsize = jnp.dtype(x.dtype).itemsize
    sub = {4: 8, 2: 16, 1: 32}.get(itemsize, 8)   # sublane multiple per dtype

    # Layout plumbing only: contiguous reshape, no data movement.
    x2 = x.reshape(r, l)

    row_bytes = l * itemsize
    if sub * row_bytes > target and l % 128 == 0:
        # Huge planes (e.g. 512x512 f32): split the lane dimension so one block
        # never exceeds the budget (avoids scoped-VMEM OOM, worst on v7x).
        rb = sub
        lb = max(128, (target // (sub * itemsize)) // 128 * 128)
        lb = min(lb, l)
    else:
        # NOTE: if l is not a multiple of 128 and also very large, we keep the
        # full row (correct, just a bigger block with masked tail stores).
        lb = l
        rb_target = max(sub, (target // row_bytes) // sub * sub)
        # Keep enough grid steps for software pipelining / megacore sharding.
        max_blocks = pl.cdiv(r, sub)
        desired = max(1, min(cfg["min_grid_steps"], max_blocks))
        rb_steps = max(sub, (r // desired) // sub * sub)
        rb = max(sub, min(rb_target, rb_steps, _round_up(r, sub)))

    num_row_blocks = pl.cdiv(r, rb)
    num_lane_blocks = pl.cdiv(l, lb)
    grid = (num_row_blocks, num_lane_blocks)
    r_pad = num_row_blocks * rb

    # Resident per-row parameter table (one tiny DMA total, not two per step).
    # Row i corresponds to plane i -> channel i % C.
    lam_rows = jnp.tile(jnp.exp(Lambda.astype(jnp.float32)), n)     # (r,)
    alpha_rows = jnp.tile(jnp.exp(Alpha.astype(jnp.float32)), n)    # (r,)
    params = jnp.stack([lam_rows, alpha_rows], axis=1)              # (r, 2)
    if r_pad > r:
        params = jnp.pad(params, ((0, r_pad - r), (0, 0)), constant_values=1.0)

    x_spec_kwargs = {}
    if cfg["input_buffers"] != 2:
        # Deeper input pipeline (v7x): hides DMA issue latency at small steps.
        x_spec_kwargs["pipeline_mode"] = pl.Buffered(cfg["input_buffers"])

    in_specs = [
        # Resident params: block == full array, constant block index.
        pl.BlockSpec((r_pad, 2), lambda i, j: (0, 0)),
        # Lane-dense data slab.
        pl.BlockSpec((rb, lb), lambda i, j: (i, j), **x_spec_kwargs),
    ]
    out_spec = pl.BlockSpec((rb, lb), lambda i, j: (i, j))

    numel = n * c * h * w
    cost = pl.CostEstimate(
        flops=2 * numel,                    # mul + add per element
        transcendentals=2 * numel,          # log2 + exp2 per element
        bytes_accessed=2 * numel * itemsize + int(params.size) * 4,
    )

    out2 = pl.pallas_call(
        _make_kernel(rb),
        out_shape=jax.ShapeDtypeStruct((r, l), x.dtype),
        grid_spec=pltpu.PrefetchScalarGridSpec(
            num_scalar_prefetch=0,
            grid=grid,
            in_specs=in_specs,
            out_specs=out_spec,
        ),
        compiler_params=pltpu.CompilerParams(
            dimension_semantics=("parallel", "parallel"),
            vmem_limit_bytes=cfg["vmem_limit_bytes"]),
        cost_estimate=cost,
    )(params, x2)

    return out2.reshape(n, c, h, w)


if __name__ == "__main__":
    key = jax.random.PRNGKey(0)
    k_x, k_l, k_a = jax.random.split(key, 3)

    N, C, H, W = 2, 4, 16, 16
    # Positive inputs (the module raises x to a positive real power; negative
    # bases would give NaN in both torch and JAX).
    x = jax.random.uniform(k_x, (N, C, H, W), dtype=jnp.float32,
                           minval=0.1, maxval=2.0)
    # torch.rand(C) equivalents.
    Lambda = jax.random.uniform(k_l, (C,), dtype=jnp.float32)
    Alpha = jax.random.uniform(k_a, (C,), dtype=jnp.float32)

    out = pospowbias(x, Lambda, Alpha)
    jax.block_until_ready(out)

    # Plain-JAX reference of the torch forward.
    ref = jnp.power(x, jnp.exp(Lambda).reshape(1, C, 1, 1)) \
        + jnp.exp(Alpha).reshape(1, C, 1, 1)

    assert out.shape == (N, C, H, W)
    assert out.dtype == jnp.float32
    np.testing.assert_allclose(np.asarray(out), np.asarray(ref),
                               rtol=2e-5, atol=2e-5)
    print("KERNEL_OK")
</pallas_src>

<mosaic_0001>
module attributes {stable_mosaic.version = 11 : i64} {
  func.func @kernel(%arg0: i32, %arg1: i32, %arg2: memref<8x2xf32, #tpu.memory_space<vmem>>, %arg3: memref<8x256xf32, #tpu.memory_space<vmem>>, %arg4: memref<8x256xf32, #tpu.memory_space<vmem>>) attributes {dimension_semantics = [#tpu.dimension_semantics<parallel>, #tpu.dimension_semantics<parallel>], iteration_bounds = array<i64: 1, 1>, scalar_prefetch = 0 : i64, scratch_operands = 0 : i64, tpu.core_type = #tpu.core_type<tc>, window_params = [{pipeline_mode = #tpu.pipeline_mode<synchronous>, transform_indices = @transform_0, window_bounds = array<i64: 8, 2>}, {transform_indices = @transform_1, window_bounds = array<i64: 8, 256>}, {transform_indices = @transform_2, window_bounds = array<i64: 8, 256>}]} {
    %c8_i32 = arith.constant 8 : i32
    %0 = arith.muli %arg0, %c8_i32 : i32
    %1 = tpu.assume_multiple %0, 8 : i32
    %2 = arith.index_cast %1 : i32 to index
    %c0 = arith.constant 0 : index
    %3 = vector.load %arg2[%2, %c0] : memref<8x2xf32, #tpu.memory_space<vmem>>, vector<8x2xf32>
    %4 = vector.extract_strided_slice %3 {offsets = [0, 0], sizes = [8, 1], strides = [1, 1]} : vector<8x2xf32> to vector<8x1xf32>
    %5 = vector.extract_strided_slice %3 {offsets = [0, 1], sizes = [8, 1], strides = [1, 1]} : vector<8x2xf32> to vector<8x1xf32>
    %c0_0 = arith.constant 0 : index
    %c0_1 = arith.constant 0 : index
    %6 = vector.load %arg3[%c0_0, %c0_1] : memref<8x256xf32, #tpu.memory_space<vmem>>, vector<8x256xf32>
    %7 = math.log %6 : vector<8x256xf32>
    %cst = arith.constant 2.000000e+00 : f32
    %8 = math.log %cst : f32
    %9 = vector.broadcast %8 : f32 to vector<8x256xf32>
    %10 = arith.divf %7, %9 : vector<8x256xf32>
    %11 = vector.broadcast %4 : vector<8x1xf32> to vector<8x256xf32>
    %12 = arith.mulf %11, %10 : vector<8x256xf32>
    %13 = math.exp2 %12 : vector<8x256xf32>
    %14 = vector.broadcast %5 : vector<8x1xf32> to vector<8x256xf32>
    %15 = arith.addf %13, %14 : vector<8x256xf32>
    %c0_2 = arith.constant 0 : index
    %c0_3 = arith.constant 0 : index
    %16 = vector.load %arg4[%c0_2, %c0_3] : memref<8x256xf32, #tpu.memory_space<vmem>>, vector<8x256xf32>
    tpu.vector_store %arg4[%c0_2, %c0_3], %15 {strides = array<i32>} : memref<8x256xf32, #tpu.memory_space<vmem>>, vector<8x256xf32>,
    return
  }
  func.func @transform_0(%arg0: i32, %arg1: i32) -> (i32, i32) {
    %c0_i32 = arith.constant 0 : i32
    %c0_i32_0 = arith.constant 0 : i32
    %c0_i32_1 = arith.constant 0 : i32
    return %c0_i32, %c0_i32_0 : i32, i32
  }
  func.func @transform_1(%arg0: i32, %arg1: i32) -> (i32, i32) {
    %c0_i32 = arith.constant 0 : i32
    return %arg0, %arg1 : i32, i32
  }
  func.func @transform_2(%arg0: i32, %arg1: i32) -> (i32, i32) {
    %c0_i32 = arith.constant 0 : i32
    return %arg0, %arg1 : i32, i32
  }
}

</mosaic_0001>

<bundles_post_ra>
// kernel: tpu_custom_call.1
= control target key start
LH: loop header
LB: loop body
LE: loop exit
PB: predicated region body
PF: predicated region fallthrough
CT: control target
= control target key end

     0   :  { %7 = vsyncpa [#allocation3], 0  ;;  %s176_s0 = inlined_call_operand.vmem [shape: f32[8,2], index: 0, kind: input, shape index: {}]   ;;  %s177_s1 = inlined_call_operand.hbm [shape: f32[8,256], index: 1, kind: input, shape index: {}]   ;;  %s178_s2 = inlined_call_operand.hbm [shape: f32[8,256], index: 2, kind: output, shape index: {}]  }
   0x1   :  { %8 = vsyncpa [#allocation4], 0  ;;  %s16_s11 = sshll.u32 %s177_s1, 4  ;;  %s147_s12 = smov [#allocation2]   ;;  %s17_s11 = int_to_ptr.hbm [resolvable:$true] %s16_s11 }
   0x2   :  { %s18_s13 = sshll.u32 %s147_s12, 4  ;;  %s19_s13 = int_to_ptr.vmem [resolvable:$true] %s18_s13 }
   0x3   :  { %21 = dma.hbm_to_vmem [thread:$0]  %s17_s11, 256, %s19_s13, [#allocation3]  }
   0x4   :  { %143 = dma.done.wait [#allocation3], 256  }
   0x5   :  { %144 = vsyncadd [#allocation3], 4294967040  ;;  %v148_v0 = vmov 0   ;;  %v28_v1 = vld [vmem:[%s176_s0] sm:$0xff]  ;;  %v149_v2 = vmov 1   ;;  %v30_v7 = vld [vmem:[#allocation2 + $0x8] sm:$0xff] }
   0x6   :  { %83 = vset.pattern.permute.xlu0 %v148_v0  ;;  %v150_v3 = vmov 0.6931472   ;;  %v29_v6 = vld [vmem:[#allocation2] sm:$0xff]  ;;  %s151_s0 = smov [#allocation5]   ;;  %s68_s18 = sshll.u32 %s178_s2, 4  ;;  %s69_s18 = int_to_ptr.hbm [resolvable:$true] %s68_s18 }
   0x7   :  { %46 = vperm.xlu0 %83, %v28_v1   ;;  %85 = vrcp.f32 %v150_v3  ;;  %s66_s1 = sshll.u32 %s151_s0, 4  ;;  %s67_s1 = int_to_ptr.vmem [resolvable:$true] %s66_s1 }
   0x8   :  { %87 = vlog2.f32 %v29_v6 }
   0x9   :  { %89 = vlog2.f32 %v30_v7 }
   0xd   :  { %v86_v4 = vpop.eup %85 }
   0xe   :  { %v36_v5 = vmul.f32 0.6931472, %v86_v4  ;;  %v88_v10 = vpop.eup %87  ;;  %vm40_vm0 = vweird.f32 %v86_v4 }
   0xf   :  { %84 = vset.pattern.permute.xlu0 %v149_v2  ;;  %v90_v11 = vpop.eup %89  ;;  %v32_v13 = vmul.f32 0.6931472, %v88_v10 }
  0x10   :  { %54 = vperm.xlu0 %84, %v28_v1   ;;  %v37_v8 = vsub.f32 1.0, %v36_v5  ;;  %v34_v14 = vmul.f32 0.6931472, %v90_v11 }
  0x12   :  { %v38_v9 = vmul.f32 %v86_v4, %v37_v8 }
  0x14   :  { %v39_v12 = vadd.f32 %v86_v4, %v38_v9 }
  0x16   :  { %v41_v15 = vsel %vm40_vm0, %v86_v4, %v39_v12 }
  0x17   :  { %v42_v16 = vmul.f32 %v41_v15, %v32_v13  ;;  %v43_v17 = vmul.f32 %v41_v15, %v34_v14 }
  0x79   :  { %v47_v18 = vpop.permute.xlu0 %46 }
  0x7a   :  { %v49_v19 = vmul.f32 %v47_v18, %v42_v16  ;;  %v50_v20 = vmul.f32 %v47_v18, %v43_v17 }
  0x7c   :  { %91 = vpow2.f32 %v49_v19 }
  0x7d   :  { %93 = vpow2.f32 %v50_v20 }
  0x82   :  { %v92_v21 = vpop.eup %91  ;;  %v55_v22 = vpop.permute.xlu0 %54 }
  0x83   :  { %v94_v23 = vpop.eup %93  ;;  %v57_v24 = vadd.f32 %v92_v21, %v55_v22 }
  0x84   :  { %v58_v25 = vadd.f32 %v94_v23, %v55_v22 }
  0x85   :  { %59 = vst [vmem:[#allocation5] sm:$0xff] %v57_v24 }
  0x86   :  { %60 = vst [vmem:[#allocation5 + $0x8] sm:$0xff] %v58_v25 }
  0x87   :  { %71 = dma.vmem_to_hbm [thread:$0]  %s67_s1, 256, %s69_s18, [#allocation4]  }
  0x88   :  { %145 = dma.done.wait [#allocation4], 256  }
  0x89   :  { %146 = vsyncadd [#allocation4], 4294967040 }
  0x8a   :  { %76 = vsyncpa [#allocation3], 1 }
  0x8b   :  { %77 = vsyncpa [#allocation4], 1 }

</bundles_post_ra>
